<compile_context>
chip_gen: v7x
topology: tpu7x:2x2x1
jax: 0.10.0
libtpu: 0.0.40
codegen_flags: <defaults>
</compile_context>

<pallas_src>
import jax
import jax.numpy as jnp
from jax.experimental import pallas as pl
from jax.experimental.pallas import tpu as pltpu


def _norm_regular_kernel(x_ref, o_ref):
    # x_ref / o_ref: (K2, LANE_TILE) block in VMEM.  Rows are lane-dense; the
    # reductions run over the K2 sublanes (axis 0), not across lanes.
    x = x_ref[...]
    k2 = x.shape[0]
    x_min = jnp.min(x, axis=0, keepdims=True) - 1e-20        # (1, L)
    col_sum = jnp.sum(x, axis=0, keepdims=True)               # (1, L)
    # (x - min')/(max - min') normalized by its sum == (x - min')/(sum - K2*min')
    denom = col_sum - k2 * x_min
    inv = pl.reciprocal(denom, approx=False)   # exact: stays within 1e-6 of the reference
    o_ref[...] = (x - x_min) * inv


def _choose_lane_tile(rows, max_lane_tile):
    """Pick the lane-tile (last dim of the block) for the (K2, rows) layout."""
    max_lane_tile = max(128, (max_lane_tile // 128) * 128)
    if rows <= 128:
        # Single full-extent block (full-dim exception to the 128 rule); the
        # only block never rounds past the array.
        return rows
    lane_tile = min(max_lane_tile, pl.cdiv(rows, 128) * 128)
    if pl.cdiv(rows, lane_tile) < 2:
        # Force >= 2 grid steps so both v7x TensorCores get a block and the
        # pipeline has something to overlap.
        lane_tile = max(128, pl.cdiv(pl.cdiv(rows, 2), 128) * 128)
    return lane_tile


def norm_regular(x, *, max_lane_tile=32768):
    """x: (B, basis, K2) float32 -> same shape, row-normalized over last axis."""
    B, N, K2 = x.shape
    rows = B * N

    # Lane-dense view: rows on the lane axis, K2 on sublanes.
    xt = x.reshape(rows, K2).T                                # (K2, rows)

    lane_tile = _choose_lane_tile(rows, max_lane_tile)
    grid = (pl.cdiv(rows, lane_tile),)

    out_t = pl.pallas_call(
        _norm_regular_kernel,
        out_shape=jax.ShapeDtypeStruct((K2, rows), x.dtype),
        grid=grid,
        in_specs=[pl.BlockSpec((K2, lane_tile), lambda r: (0, r))],
        out_specs=pl.BlockSpec((K2, lane_tile), lambda r: (0, r)),
        compiler_params=pltpu.CompilerParams(
            dimension_semantics=("parallel",),
            # Block x double-buffer x (in+out) stays ~8 MiB at the default
            # tile; 48 MiB leaves headroom under v7x's 64 MiB physical VMEM.
            vmem_limit_bytes=48 * 1024 * 1024,
        ),
    )(xt)
    return out_t.T.reshape(B, N, K2)


def norm_regular_ref(x):
    # pure-JAX reference mirroring the PyTorch forward exactly
    x_max = jnp.max(x, axis=2, keepdims=True)
    x_min = jnp.min(x, axis=2, keepdims=True) - 1e-20
    x_out = (x - x_min) / (x_max - x_min)
    x_norm = jnp.sum(x_out, axis=2, keepdims=True)
    return x_out / x_norm


if __name__ == "__main__":
    kernel_size = 3

    # Small shape matching the module contract: (batch, basis, kernel_size**2).
    key = jax.random.PRNGKey(0)
    x = jax.random.normal(key, (2, 4, kernel_size ** 2), dtype=jnp.float32)
    out = norm_regular(x)
    jax.block_until_ready(out)
    ref = norm_regular_ref(x)
    assert out.shape == x.shape
    assert jnp.allclose(out, ref, atol=1e-6, rtol=1e-6)

    k1, k2_key, _ = jax.random.split(jax.random.PRNGKey(1), 3)

    # rows (=185) not a multiple of 128: exercises the padded last lane block
    # (OOB reads only feed masked writes; each output column is independent).
    x2 = jax.random.normal(k1, (37, 5, kernel_size ** 2), dtype=jnp.float32)
    out2 = norm_regular(x2)
    jax.block_until_ready(out2)
    assert out2.shape == x2.shape
    assert jnp.allclose(out2, norm_regular_ref(x2), atol=1e-6, rtol=1e-6)

    # rows (=2048): exercises the >=2-step "parallel" grid with dense blocks.
    x3 = jax.random.normal(k2_key, (64, 32, kernel_size ** 2), dtype=jnp.float32)
    out3 = norm_regular(x3)
    jax.block_until_ready(out3)
    assert out3.shape == x3.shape
    assert jnp.allclose(out3, norm_regular_ref(x3), atol=1e-6, rtol=1e-6)

    print("KERNEL_OK")
</pallas_src>

<mosaic_0001>
module attributes {stable_mosaic.version = 11 : i64} {
  func.func @_norm_regular_kernel(%arg0: i32, %arg1: memref<9x8xf32, #tpu.memory_space<vmem>>, %arg2: memref<9x8xf32, #tpu.memory_space<vmem>>) attributes {dimension_semantics = [#tpu.dimension_semantics<parallel>], iteration_bounds = array<i64: 1>, scalar_prefetch = 0 : i64, scratch_operands = 0 : i64, tpu.core_type = #tpu.core_type<tc>, window_params = [{transform_indices = @transform_0, window_bounds = array<i64: 9, 8>}, {transform_indices = @transform_1, window_bounds = array<i64: 9, 8>}]} {
    %c0 = arith.constant 0 : index
    %c0_0 = arith.constant 0 : index
    %0 = vector.load %arg1[%c0, %c0_0] : memref<9x8xf32, #tpu.memory_space<vmem>>, vector<9x8xf32>
    %cst = arith.constant dense<0x7F800000> : vector<8xf32>
    %1 = vector.multi_reduction <minimumf>, %0, %cst [0] : vector<9x8xf32> to vector<8xf32>
    %2 = vector.shape_cast %1 : vector<8xf32> to vector<1x8xf32>
    %cst_1 = arith.constant 9.99999968E-21 : f32
    %3 = vector.broadcast %cst_1 : f32 to vector<1x8xf32>
    %4 = arith.subf %2, %3 : vector<1x8xf32>
    %cst_2 = arith.constant dense<0.000000e+00> : vector<8xf32>
    %5 = vector.multi_reduction <add>, %0, %cst_2 [0] : vector<9x8xf32> to vector<8xf32>
    %6 = vector.shape_cast %5 : vector<8xf32> to vector<1x8xf32>
    %cst_3 = arith.constant 9.000000e+00 : f32
    %7 = vector.broadcast %cst_3 : f32 to vector<1x8xf32>
    %8 = arith.mulf %7, %4 : vector<1x8xf32>
    %9 = arith.subf %6, %8 : vector<1x8xf32>
    %10 = tpu.reciprocal %9 : vector<1x8xf32> -> vector<1x8xf32>
    %11 = vector.broadcast %4 : vector<1x8xf32> to vector<9x8xf32>
    %12 = arith.subf %0, %11 : vector<9x8xf32>
    %13 = vector.broadcast %10 : vector<1x8xf32> to vector<9x8xf32>
    %14 = arith.mulf %12, %13 : vector<9x8xf32>
    %c0_4 = arith.constant 0 : index
    %c0_5 = arith.constant 0 : index
    %15 = vector.load %arg2[%c0_4, %c0_5] : memref<9x8xf32, #tpu.memory_space<vmem>>, vector<9x8xf32>
    tpu.vector_store %arg2[%c0_4, %c0_5], %14 {strides = array<i32>} : memref<9x8xf32, #tpu.memory_space<vmem>>, vector<9x8xf32>,
    return
  }
  func.func @transform_0(%arg0: i32) -> (i32, i32) {
    %c0_i32 = arith.constant 0 : i32
    %c0_i32_0 = arith.constant 0 : i32
    return %c0_i32, %arg0 : i32, i32
  }
  func.func @transform_1(%arg0: i32) -> (i32, i32) {
    %c0_i32 = arith.constant 0 : i32
    %c0_i32_0 = arith.constant 0 : i32
    return %c0_i32, %arg0 : i32, i32
  }
}

</mosaic_0001>

<bundles_post_ra>
// kernel: tpu_custom_call.1
= control target key start
LH: loop header
LB: loop body
LE: loop exit
PB: predicated region body
PF: predicated region fallthrough
CT: control target
= control target key end

     0   :  { %vm10_vm0 = vcmask 64512   ;;  %vm12_vm1 = vcmask 57344   ;;  %s75_s0 = inlined_call_operand.vmem [shape: f32[9,8], index: 0, kind: input, shape index: {}]   ;;  %s76_s1 = inlined_call_operand.vmem [shape: f32[9,8], index: 1, kind: output, shape index: {}]  }
   0x1   :  { %v8_v0 = vld [vmem:[%s75_s0] sm:$0xff]  ;;  %v9_v1 = vld [vmem:[%s75_s0 + $0x8] sm:$0x1] }
   0x2   :  { %v11_v2 = vsel %vm10_vm0, %v8_v0, inf  ;;  %v13_v3 = vsel %vm12_vm1, %v9_v1, inf  ;;  %v22_v4 = vsel %vm10_vm0, %v8_v0, 0.0  ;;  %v23_v5 = vsel %vm12_vm1, %v9_v1, 0.0 }
   0x3   :  { %v14_v6 = vmin.f32 %v11_v2, %v13_v3  ;;  %v24_v7 = vadd.f32 %v23_v5, %v22_v4 }
   0x5   :  { %v15_v8 = vrot.slane %v14_v6, 4  ;;  %v25_v9 = vrot.slane %v24_v7, 4 }
   0x7   :  { %v16_v10 = vmin.f32 %v14_v6, %v15_v8  ;;  %v26_v11 = vadd.f32 %v25_v9, %v24_v7 }
   0x9   :  { %v17_v12 = vrot.slane %v16_v10, 2  ;;  %v27_v13 = vrot.slane %v26_v11, 2 }
   0xb   :  { %v18_v14 = vmin.f32 %v16_v10, %v17_v12  ;;  %v28_v15 = vadd.f32 %v27_v13, %v26_v11 }
   0xd   :  { %v19_v16 = vrot.slane %v18_v14, 1  ;;  %v29_v17 = vrot.slane %v28_v15, 1 }
   0xf   :  { %v20_v18 = vmin.f32 %v18_v14, %v19_v16  ;;  %v30_v20 = vadd.f32 %v29_v17, %v28_v15 }
  0x11   :  { %v44_v19 = vadd.f32 -1e-20, %v20_v18 }
  0x13   :  { %v31_v21 = vmul.f32 9.0, %v44_v19  ;;  %v34_v23 = vsub.f32 %v8_v0, %v44_v19  ;;  %v35_v24 = vsub.f32 %v9_v1, %v44_v19 }
  0x15   :  { %v32_v22 = vsub.f32 %v30_v20, %v31_v21 }
  0x17   :  { %45 = vrcp.f32 %v32_v22 }
  0x21   :  { %v46_v25 = vpop.eup %45 }
  0x22   :  { %v36_v26 = vmul.f32 %v46_v25, %v34_v23  ;;  %v37_v27 = vmul.f32 %v46_v25, %v35_v24 }
  0x24   :  { %38 = vst.msk [vmem:[%s76_s1] sm:$0xff] %vm10_vm0, %v36_v26 }
  0x25   :  { %39 = vst.msk [vmem:[%s76_s1 + $0x8] sm:$0x1] %vm12_vm1, %v37_v27 }

</bundles_post_ra>
